<compile_context>
chip_gen: v7x
topology: tpu7x:2x2x1
jax: 0.10.0
libtpu: 0.0.40
codegen_flags: <defaults>
</compile_context>

<pallas_src>
import jax
import jax.numpy as jnp
from jax.experimental import pallas as pl
from jax.experimental.pallas import tpu as pltpu

_LANE = 128
_SUBLANE = 8


def _round_up(x, m):
    return ((x + m - 1) // m) * m


def _topic_kernel(x_ref, w_ref, b_ref, o_ref):
    # Single fused matmul on the MXU (bf16 in, f32 accumulate), then
    # bias-add + tanh in f32, cast to the output dtype on store.
    acc = jnp.dot(x_ref[...], w_ref[...], preferred_element_type=jnp.float32)
    acc += b_ref[...]
    o_ref[...] = jnp.tanh(acc).astype(o_ref.dtype)


def prepare_topic_params(w_t_h, b_t_h, w_t_ctx, b_t_ctx):
    """One-time (offline) parameter prep.

    w_t_h: [H, T], w_t_ctx: [C, T]   (torch weights pre-transposed to [in, out])
    b_t_h, b_t_ctx: [1, T] (or [T])

    Returns:
      w_fused: [K_pad, T_pad] bf16, K = H + C rounded up to a multiple of 128,
               T rounded up to a multiple of 128 (lane-dense output).
      b_fused: [1, T_pad] f32, both biases folded into one.
    """
    H, T = w_t_h.shape
    C = w_t_ctx.shape[0]
    K = H + C
    k_pad = _round_up(K, _LANE)
    t_pad = _round_up(T, _LANE)

    w = jnp.concatenate([w_t_h, w_t_ctx], axis=0).astype(jnp.float32)
    w = jnp.pad(w, ((0, k_pad - K), (0, t_pad - T)))

    b = (jnp.asarray(b_t_h).reshape(1, T)
         + jnp.asarray(b_t_ctx).reshape(1, T)).astype(jnp.float32)
    b = jnp.pad(b, ((0, 0), (0, t_pad - T)))

    return w.astype(jnp.bfloat16), b


def topic_generator(hidden_state, context, w_fused, b_fused, *, topic_size,
                    tile_b=128):
    """Pallas TopicGenerator.forward.

    hidden_state: [B, H], context: [B, C]
    w_fused: [K_pad, T_pad] bf16, b_fused: [1, T_pad] f32 (from prepare_topic_params)
    returns topic: [B, topic_size] in hidden_state.dtype
    """
    B, H = hidden_state.shape
    _, C = context.shape
    K = H + C
    k_pad, t_pad = w_fused.shape
    out_dtype = hidden_state.dtype

    # Fused activation, bf16 for the MXU, zero-padded to the kernel tile.
    x = jnp.concatenate([hidden_state, context], axis=-1).astype(jnp.bfloat16)
    tile_b = min(tile_b, _round_up(B, _SUBLANE))
    b_pad = _round_up(B, tile_b)
    x = jnp.pad(x, ((0, b_pad - B), (0, k_pad - K)))

    grid = (b_pad // tile_b,)
    out = pl.pallas_call(
        _topic_kernel,
        out_shape=jax.ShapeDtypeStruct((b_pad, t_pad), out_dtype),
        grid=grid,
        in_specs=[
            pl.BlockSpec((tile_b, k_pad), lambda i: (i, 0)),   # x tile over batch
            pl.BlockSpec((k_pad, t_pad), lambda i: (0, 0)),    # fused weight (resident)
            pl.BlockSpec((1, t_pad), lambda i: (0, 0)),        # fused bias (resident)
        ],
        out_specs=pl.BlockSpec((tile_b, t_pad), lambda i: (i, 0)),
        compiler_params=pltpu.CompilerParams(
            dimension_semantics=("parallel",)),
    )(x, w_fused, b_fused)

    return out[:B, :topic_size]


if __name__ == "__main__":
    # Small shapes consistent with the module's forward.
    batch = 2
    hidden_size = 32
    context_size = 48
    topic_size = 64

    key = jax.random.PRNGKey(0)
    k1, k2, k3, k4, k5, k6 = jax.random.split(key, 6)

    hidden_state = jax.random.normal(k1, (batch, hidden_size), dtype=jnp.float32)
    context = jax.random.normal(k2, (batch, context_size), dtype=jnp.float32)

    # Synthetic parameters in the shapes nn.Linear would create, stored
    # transposed: [in_features, out_features].
    w_t_h = jax.random.normal(k3, (hidden_size, topic_size), dtype=jnp.float32) * 0.1
    b_t_h = jax.random.normal(k4, (1, topic_size), dtype=jnp.float32) * 0.1
    w_t_ctx = jax.random.normal(k5, (context_size, topic_size), dtype=jnp.float32) * 0.1
    b_t_ctx = jax.random.normal(k6, (1, topic_size), dtype=jnp.float32) * 0.1

    # One-time param prep (fuse + fold + pad + bf16).
    w_fused, b_fused = prepare_topic_params(w_t_h, b_t_h, w_t_ctx, b_t_ctx)

    topic = topic_generator(hidden_state, context, w_fused, b_fused,
                            topic_size=topic_size)
    topic = jax.block_until_ready(topic)
    assert topic.shape == (batch, topic_size)

    # Tight reference: same bf16-rounded operands, f32 accumulation.
    x_bf = jnp.concatenate([hidden_state, context], axis=-1) \
        .astype(jnp.bfloat16).astype(jnp.float32)
    w_bf = jnp.concatenate([w_t_h, w_t_ctx], axis=0) \
        .astype(jnp.bfloat16).astype(jnp.float32)
    ref_bf16 = jnp.tanh(x_bf @ w_bf + b_t_h + b_t_ctx)
    assert jnp.allclose(topic, ref_bf16, atol=1e-4, rtol=1e-4)

    # Loose reference: pure f32 PyTorch semantics (bf16 MXU rounding allowed).
    ref_f32 = jnp.tanh(hidden_state @ w_t_h + b_t_h + context @ w_t_ctx + b_t_ctx)
    assert jnp.allclose(topic, ref_f32, atol=3e-2, rtol=3e-2)

    print("KERNEL_OK")
</pallas_src>

<mosaic_0001>
module attributes {stable_mosaic.version = 11 : i64} {
  func.func @_topic_kernel(%arg0: i32, %arg1: memref<8x128xbf16, #tpu.memory_space<vmem>>, %arg2: memref<128x128xbf16, #tpu.memory_space<vmem>>, %arg3: memref<1x128xf32, #tpu.memory_space<vmem>>, %arg4: memref<8x128xf32, #tpu.memory_space<vmem>>) attributes {dimension_semantics = [#tpu.dimension_semantics<parallel>], iteration_bounds = array<i64: 1>, scalar_prefetch = 0 : i64, scratch_operands = 0 : i64, tpu.core_type = #tpu.core_type<tc>, window_params = [{transform_indices = @transform_0, window_bounds = array<i64: 8, 128>}, {pipeline_mode = #tpu.pipeline_mode<synchronous>, transform_indices = @transform_1, window_bounds = array<i64: 128, 128>}, {pipeline_mode = #tpu.pipeline_mode<synchronous>, transform_indices = @transform_2, window_bounds = array<i64: 1, 128>}, {transform_indices = @transform_3, window_bounds = array<i64: 8, 128>}]} {
    %c0 = arith.constant 0 : index
    %c0_0 = arith.constant 0 : index
    %0 = vector.load %arg1[%c0, %c0_0] : memref<8x128xbf16, #tpu.memory_space<vmem>>, vector<8x128xbf16>
    %c0_1 = arith.constant 0 : index
    %c0_2 = arith.constant 0 : index
    %1 = vector.load %arg2[%c0_1, %c0_2] : memref<128x128xbf16, #tpu.memory_space<vmem>>, vector<128x128xbf16>
    %cst = arith.constant dense<0.000000e+00> : vector<8x128xf32>
    %2 = tpu.matmul %0, %1, %cst {dimension_numbers = #tpu.dot_dimension_numbers<[1], [0], [0], [1], [0, 0, 1, 1], [], []>} : vector<8x128xbf16>, vector<128x128xbf16>, vector<8x128xf32> -> vector<8x128xf32>
    %c0_3 = arith.constant 0 : index
    %c0_4 = arith.constant 0 : index
    %3 = vector.load %arg3[%c0_3, %c0_4] : memref<1x128xf32, #tpu.memory_space<vmem>>, vector<1x128xf32>
    %4 = vector.broadcast %3 : vector<1x128xf32> to vector<8x128xf32>
    %5 = arith.addf %2, %4 : vector<8x128xf32>
    %6 = math.tanh %5 : vector<8x128xf32>
    %c0_5 = arith.constant 0 : index
    %c0_6 = arith.constant 0 : index
    %7 = vector.load %arg4[%c0_5, %c0_6] : memref<8x128xf32, #tpu.memory_space<vmem>>, vector<8x128xf32>
    tpu.vector_store %arg4[%c0_5, %c0_6], %6 {strides = array<i32>} : memref<8x128xf32, #tpu.memory_space<vmem>>, vector<8x128xf32>,
    return
  }
  func.func @transform_0(%arg0: i32) -> (i32, i32) {
    %c0_i32 = arith.constant 0 : i32
    %c0_i32_0 = arith.constant 0 : i32
    return %arg0, %c0_i32 : i32, i32
  }
  func.func @transform_1(%arg0: i32) -> (i32, i32) {
    %c0_i32 = arith.constant 0 : i32
    %c0_i32_0 = arith.constant 0 : i32
    %c0_i32_1 = arith.constant 0 : i32
    return %c0_i32, %c0_i32_0 : i32, i32
  }
  func.func @transform_2(%arg0: i32) -> (i32, i32) {
    %c0_i32 = arith.constant 0 : i32
    %c0_i32_0 = arith.constant 0 : i32
    %c0_i32_1 = arith.constant 0 : i32
    return %c0_i32, %c0_i32_0 : i32, i32
  }
  func.func @transform_3(%arg0: i32) -> (i32, i32) {
    %c0_i32 = arith.constant 0 : i32
    %c0_i32_0 = arith.constant 0 : i32
    return %arg0, %c0_i32 : i32, i32
  }
}

</mosaic_0001>

<bundles_post_ra>
// kernel: tpu_custom_call.1
= control target key start
LH: loop header
LB: loop body
LE: loop exit
PB: predicated region body
PF: predicated region fallthrough
CT: control target
= control target key end

     0   :  { %8 = vsyncpa [#allocation3], 0  ;;  %s372_s0 = inlined_call_operand.hbm [shape: bf16[8,128], index: 0, kind: input, shape index: {}]   ;;  %s373_s1 = inlined_call_operand.hbm [shape: bf16[128,128], index: 1, kind: input, shape index: {}]   ;;  %s374_s2 = inlined_call_operand.vmem [shape: f32[1,128], index: 2, kind: input, shape index: {}]   ;;  %s375_s3 = inlined_call_operand.hbm [shape: f32[8,128], index: 3, kind: output, shape index: {}]  }
   0x1   :  { %9 = vsyncpa [#allocation6], 0 }
   0x2   :  { %10 = vsyncpa [#allocation4], 0  ;;  %s299_s12 = smov [#allocation2]   ;;  %s300_s14 = smov [#allocation5]  }
   0x3   :  { %s17_s13 = sshll.u32 %s299_s12, 4  ;;  %s26_s15 = sshll.u32 %s300_s14, 4  ;;  %s18_s13 = int_to_ptr.vmem [resolvable:$true] %s17_s13  ;;  %s326_s15 = int_to_ptr.vmem [resolvable:$true] %s26_s15 }
   0x4   :  { %s227_s18 = scalar_lea.hbm %s372_s0, 64 }
   0x5   :  { %p228_p0 = scmp.ne.s32.totalorder %s372_s0, %s227_s18  ;;  %p231_p1 = scmp.lt.u32.totalorder %s227_s18, %s372_s0 }
   0x7   :  { %p233_p2 = pnand %p231_p1, %p228_p0 }
   0x9   :  { %236 = shalt.err (!%p233_p2)
}
   0xa   :  { %s237_s23 = scalar_lea.vmem %s18_s13, 64  ;;  %p242_p4 = scmp.lt.s32.totalorder %s18_s13, %s18_s13 }
   0xb   :  { %p238_p3 = scmp.ne.s32.totalorder %s18_s13, %s237_s23  ;;  %p243_p5 = scmp.lt.s32.totalorder %s237_s23, %s237_s23 }
   0xd   :  { %p244_p6 = por %p243_p5, %p242_p4 }
   0xf   :  { %p245_p7 = pnand %p244_p6, %p238_p3 }
  0x11   :  { %248 = shalt.err (!%p245_p7)
}
  0x12   :  { %20 = dma.hbm_to_vmem [thread:$0]  %s372_s0, 64, %s18_s13, [#allocation3]  }
  0x13   :  { %s249_s28 = scalar_lea.hbm %s373_s1, 1024 }
  0x14   :  { %p250_p8 = scmp.ne.s32.totalorder %s373_s1, %s249_s28  ;;  %p253_p9 = scmp.lt.u32.totalorder %s249_s28, %s373_s1 }
  0x16   :  { %p255_p10 = pnand %p253_p9, %p250_p8 }
  0x18   :  { %258 = shalt.err (!%p255_p10)
}
  0x19   :  { %s259_s6 = scalar_lea.vmem %s326_s15, 1024  ;;  %p264_p12 = scmp.lt.s32.totalorder %s326_s15, %s326_s15 }
  0x1a   :  { %p260_p11 = scmp.ne.s32.totalorder %s326_s15, %s259_s6  ;;  %p265_p13 = scmp.lt.s32.totalorder %s259_s6, %s259_s6 }
  0x1c   :  { %p266_p0 = por %p265_p13, %p264_p12 }
  0x1e   :  { %p267_p1 = pnand %p266_p0, %p260_p11 }
  0x20   :  { %270 = shalt.err (!%p267_p1)
}
  0x21   :  { %s301_s0 = smov 64   ;;  %s302_s7 = smov 4  }
  0x22   :  { %32 = dma.hbm_to_vmem [thread:$0]  %s373_s1, 1024, %s326_s15, [#allocation6], %s301_s0, %s301_s0, %s302_s7  }
  0x23   :  { %293 = dma.done.wait [#allocation3], 64  }
  0x24   :  { %294 = vsyncadd [#allocation3], 4294967232 }
  0x25   :  { %295 = dma.done.wait [#allocation6], 1024  }
  0x26   :  { %296 = vsyncadd [#allocation6], 4294966272  ;;  %v303_v0 = vmov 0.0   ;;  %vm304_vm0 = vmmov 0   ;;  %v217_v1 = vld [vmem:[#allocation5] sm:$0xff]   ;;  %v218_v2 = vld [vmem:[#allocation5 + $0x8] sm:$0xff]  }
  0x27   :  { %190 = vmatprep.subr.bf16.mxu0 %v303_v0  ;;  %206 = vmatprep.mubr.msk.bf16.mxu0 %vm304_vm0, %v303_v0  ;;  %v219_v3 = vld [vmem:[#allocation5 + $0x10] sm:$0xff]   ;;  %v220_v4 = vld [vmem:[#allocation5 + $0x18] sm:$0xff]   ;;  %v221_v5 = vld [vmem:[#allocation5 + $0x20] sm:$0xff]   ;;  %s305_s11 = smov [#allocation7]  }
  0x28   :  { %191 = vmatpush3.bf16.msra.mxu0 %v217_v1  ;;  %v222_v6 = vld [vmem:[#allocation5 + $0x28] sm:$0xff]   ;;  %v223_v7 = vld [vmem:[#allocation5 + $0x30] sm:$0xff]   ;;  %v224_v8 = vld [vmem:[#allocation5 + $0x38] sm:$0xff]   ;;  %s162_s12 = sshll.u32 %s305_s11, 4  ;;  %s163_s12 = int_to_ptr.vmem [resolvable:$true] %s162_s12 }
  0x29   :  { %192 = vmatprep.subr.bf16.mxu0 %v303_v0  ;;  %v42_v9 = vld [vmem:[#allocation2] sm:$0xf]  ;;  %s271_s13 = scalar_lea.vmem %s163_s12, 128  ;;  %p276_p3 = scmp.lt.s32.totalorder %s163_s12, %s163_s12 }
  0x2a   :  { %v172_v10 = vld [vmem:[%s374_s2] ss:$0 sm:$0xff]  ;;  %p272_p2 = scmp.ne.s32.totalorder %s163_s12, %s271_s13  ;;  %p277_p4 = scmp.lt.s32.totalorder %s271_s13, %s271_s13 }
  0x2c   :  { %193 = vmatpush3.bf16.msra.mxu0 %v218_v2  ;;  %p278_p5 = por %p277_p4, %p276_p3 }
  0x2d   :  { %194 = vmatprep.subr.bf16.mxu0 %v303_v0 }
  0x2e   :  { %p279_p6 = pnand %p278_p5, %p272_p2 }
  0x30   :  { %195 = vmatpush3.bf16.msra.mxu0 %v219_v3 }
  0x31   :  { %196 = vmatprep.subr.bf16.mxu0 %v303_v0 }
  0x34   :  { %197 = vmatpush3.bf16.msra.mxu0 %v220_v4 }
  0x35   :  { %198 = vmatprep.subr.bf16.mxu0 %v303_v0 }
  0x38   :  { %199 = vmatpush3.bf16.msra.mxu0 %v221_v5 }
  0x39   :  { %200 = vmatprep.subr.bf16.mxu0 %v303_v0 }
  0x3c   :  { %201 = vmatpush3.bf16.msra.mxu0 %v222_v6 }
  0x3d   :  { %202 = vmatprep.subr.bf16.mxu0 %v303_v0 }
  0x40   :  { %203 = vmatpush3.bf16.msra.mxu0 %v223_v7 }
  0x41   :  { %204 = vmatprep.subr.bf16.mxu0 %v303_v0 }
  0x44   :  { %205 = vmatpush3.bf16.msra.mxu0 %v224_v8 }
  0x47   :  { %207 = vmatmul.mubr.bf16.vlgmr.msra.gmra.mrb[0].mxu0 %v42_v9 }
 0x11a   :  { %v148_v11 = vpop.f32.mrb[0].mxu0 }
 0x11b   :  { %v149_v12 = vadd.f32 %v172_v10, %v148_v11  ;;  %v208_v13 = vpop.f32.mrb[1].mxu0 }
 0x11c   :  { %v151_v14 = vpop.f32.mrb[2].mxu0 }
 0x11d   :  { %225 = vtanh.f32 %v149_v12  ;;  %v209_v15 = vpop.f32.mrb[3].mxu0 }
 0x127   :  { %v226_v16 = vpop.eup %225 }
 0x128   :  { %155 = vst [vmem:[#allocation7] sm:$0xff] %v226_v16 }
 0x129   :  { %282 = shalt.err (!%p279_p6)
}
 0x12a   :  { %s283_s15 = scalar_lea.hbm %s375_s3, 128 }
 0x12b   :  { %p284_p7 = scmp.ne.s32.totalorder %s375_s3, %s283_s15  ;;  %p287_p8 = scmp.lt.u32.totalorder %s283_s15, %s375_s3 }
 0x12d   :  { %p289_p9 = pnand %p287_p8, %p284_p7 }
 0x12f   :  { %292 = shalt.err (!%p289_p9)
}
 0x130   :  { %165 = dma.vmem_to_hbm [thread:$0]  %s163_s12, 128, %s375_s3, [#allocation4]  }
 0x131   :  { %297 = dma.done.wait [#allocation4], 128  }
 0x132   :  { %298 = vsyncadd [#allocation4], 4294967168 }
 0x133   :  { %169 = vsyncpa [#allocation3], 1 }
 0x134   :  { %170 = vsyncpa [#allocation6], 1 }
 0x135   :  { %171 = vsyncpa [#allocation4], 1 }

</bundles_post_ra>
